<compile_context>
chip_gen: v6e
topology: v6e:2x2x1
jax: 0.10.0
libtpu: 0.0.40
codegen_flags: <defaults>
</compile_context>

<pallas_src>
import functools
import math
import re

import numpy as np
import jax
import jax.numpy as jnp
from jax.experimental import pallas as pl
from jax.experimental.pallas import tpu as pltpu


# ---------------------------------------------------------------------------
# Pallas kernel.
#   grid = (B, HW // TQ), both axes "parallel" (no cross-iteration state).
#   x_ref   : (1, TQ, C)    f32   query tile (also the residual)
#   m_ref   : (1, C, KV)    bf16  folded key matrix  M = w_theta^T @ phi^T
#   g_ref   : (1, KV, C/2)  bf16  pooled g projection
#   wo_ref  : (C/2, C)      bf16  output 1x1-conv weight (matmul form)
#   gamma   : (1, 1)        f32   scalar in SMEM
#   out_ref : (1, TQ, C)    f32
# ---------------------------------------------------------------------------
def _attention_kernel(x_ref, m_ref, g_ref, wo_ref, gamma_ref, out_ref, *,
                      exp_in_bf16):
    x = x_ref[0]                                               # (TQ, C) f32

    # logits = x @ M   (theta folded into M -> contraction depth C, not C/8)
    logits = jnp.dot(x.astype(jnp.bfloat16), m_ref[0],
                     preferred_element_type=jnp.float32)       # (TQ, KV) f32

    row_max = jnp.max(logits, axis=-1, keepdims=True)          # f32
    if exp_in_bf16:
        # v6e/v7x: bf16 EUP exp (argument centered in f32 first); the
        # denominator accumulates in f32.
        e = jnp.exp((logits - row_max).astype(jnp.bfloat16))   # (TQ, KV) bf16
        denom = jnp.sum(e.astype(jnp.float32), axis=-1, keepdims=True)
    else:
        # v5e and older: keep the softmax arithmetic fully in f32.
        e32 = jnp.exp(logits - row_max)
        denom = jnp.sum(e32, axis=-1, keepdims=True)
        e = e32.astype(jnp.bfloat16)

    # Deferred softmax normalization: (e @ g) * (1/denom), reciprocal on EUP.
    o_pre = jnp.dot(e, g_ref[0], preferred_element_type=jnp.float32)
    o_pre = o_pre * pl.reciprocal(denom, approx=True)          # (TQ, C2) f32

    o = jnp.dot(o_pre.astype(jnp.bfloat16), wo_ref[...],
                preferred_element_type=jnp.float32)            # (TQ, C) f32

    out_ref[0] = (gamma_ref[0, 0] * o + x).astype(out_ref.dtype)


# ---------------------------------------------------------------------------
# Spectral norm (SN.W_ with num_svs=1, num_itrs=1) -- parameter glue in JAX.
# ---------------------------------------------------------------------------
def _l2_normalize(v, eps=1e-12):
    return v / jnp.maximum(jnp.sqrt(jnp.sum(v * v)), eps)


def spectral_normalize(w_conv, u):
    """One power-iteration step; returns weight / sigma (as SN.W_ does)."""
    out_ch = w_conv.shape[0]
    w_mat = w_conv.reshape(out_ch, -1)                  # (out, in)
    v = _l2_normalize(jnp.matmul(u, w_mat))             # (1, in)
    u_new = _l2_normalize(jnp.matmul(v, w_mat.T))       # (1, out)
    sv = jnp.matmul(jnp.matmul(v, w_mat.T), u_new.T)[0, 0]
    # TODO(synk): training-mode PyTorch also writes u_new / sv back into the
    # module buffers (in-place state); not modeled for the forward pass.
    return w_conv / sv


# ---------------------------------------------------------------------------
# Generation-aware policy helpers.
# ---------------------------------------------------------------------------
def _tpu_generation():
    try:
        kind = jax.devices()[0].device_kind.lower()
    except Exception:
        return 0
    m = re.search(r"(\d+)", kind)
    return int(m.group(1)) if m else 0


def _vmem_capacity_bytes():
    try:
        return int(pltpu.get_tpu_info().vmem_capacity_bytes)
    except Exception:
        return 64 * 1024 * 1024          # conservative (v7x per-core VMEM)


def _pick_tq(hw, kv, vmem_cap_bytes, tq_hint=None):
    """Largest multiple-of-8 divisor of hw within the softmax-temporary budget."""
    # f32 logits + exp intermediates ~ 3 * tq * kv * 4 bytes; keep under ~1/3
    # of the (headroom-adjusted) VMEM cap.
    budget = max(vmem_cap_bytes // 3, 1)
    cap = budget // max(1, kv * 12)
    cap = max(8, min(cap, 1024, hw))
    if tq_hint is not None:
        cap = min(cap, max(8, int(tq_hint)))
    best = None
    d = 8
    while d <= min(cap, hw):
        if hw % d == 0:
            best = d
        d += 8
    # fallback: a single block covering the full axis satisfies the (8,128) rule
    return best if best is not None else hw


# ---------------------------------------------------------------------------
# Wrapper: NCHW (default, PyTorch layout) or NHWC in/out.
# ---------------------------------------------------------------------------
def attention_forward(x, params, *, tq=None, channels_last=False):
    if channels_last:
        B, H, W, C = x.shape
        x_nhwc = x.astype(jnp.float32)
    else:
        B, C, H, W = x.shape
        x_nhwc = jnp.transpose(x, (0, 2, 3, 1)).astype(jnp.float32)
    assert C % 8 == 0 and H % 2 == 0 and W % 2 == 0
    HW, KV = H * W, (H * W) // 4
    C8, C2 = C // 8, C // 2

    # -- spectral-normalized 1x1-conv weights (matmul form) ------------------
    wt = spectral_normalize(params["w_theta"], params["u_theta"]).reshape(C8, C)
    wp = spectral_normalize(params["w_phi"], params["u_phi"]).reshape(C8, C)
    wg = spectral_normalize(params["w_g"], params["u_g"]).reshape(C2, C)
    wo = spectral_normalize(params["w_o"], params["u_o"]).reshape(C, C2)
    gamma = jnp.asarray(params["gamma"], jnp.float32).reshape(1, 1)

    x_flat = x_nhwc.reshape(B, HW, C)                 # queries + residual, f32

    # -- key-side precompute, hoisted out of the kernel ----------------------
    # 1x1 conv then exact 2x2 max-pool (conv is linear, so conv-then-pool is
    # required, matching the PyTorch order), all in f32; one bf16 rounding.
    def conv_pool(w_mat):                              # w_mat: (Cout, C)
        y = jnp.einsum("oc,bhwc->bhwo", w_mat, x_nhwc)
        y = y.reshape(B, H // 2, 2, W // 2, 2, -1).max(axis=(2, 4))
        return y.reshape(B, KV, -1)                    # (B, KV, Cout) f32

    phi = conv_pool(wp)                                            # (B, KV, C8)
    g_pool = conv_pool(wg).astype(jnp.bfloat16)                    # (B, KV, C2)
    # Fold theta into the logits matmul:  logits = (x @ wt^T) @ phi^T = x @ M
    m_fold = jnp.einsum("oc,bpo->bcp", wt, phi).astype(jnp.bfloat16)  # (B,C,KV)
    wo_mat = wo.T.astype(jnp.bfloat16)                             # (C2, C)

    # -- generation-aware tile / VMEM policy ---------------------------------
    vmem_cap = int(_vmem_capacity_bytes() * 0.8)       # ~20% headroom (v7x!)
    tq = _pick_tq(HW, KV, vmem_cap, tq)
    n_q = HW // tq

    vmem_need = (
        2 * 2 * tq * C * 4            # x + out blocks, f32, double-buffered
        + 2 * C * KV * 2              # M block, bf16, double-buffered
        + 2 * KV * C2 * 2             # g block, bf16, double-buffered
        + 2 * C2 * C * 2              # w_o, bf16, double-buffered
        + 3 * tq * KV * 4             # logits / exp / softmax temporaries
    )
    vmem_limit = int(min(vmem_cap, max(32 * 1024 * 1024, 2 * vmem_need)))

    # Advisory cost estimate so XLA can overlap the surrounding layout glue.
    flops = 2 * B * HW * KV * (C + C2) + 2 * B * HW * C2 * C
    bytes_accessed = (B * HW * C * 4                   # x in
                      + B * C * KV * 2 + B * KV * C2 * 2 + C2 * C * 2
                      + B * HW * C * 4)                # out
    cost = pl.CostEstimate(flops=int(flops),
                           transcendentals=int(B * HW * KV),
                           bytes_accessed=int(bytes_accessed))

    grid_spec = pltpu.PrefetchScalarGridSpec(
        num_scalar_prefetch=0,
        grid=(B, n_q),
        in_specs=[
            pl.BlockSpec((1, tq, C), lambda b, q: (b, q, 0)),      # x tile
            pl.BlockSpec((1, C, KV), lambda b, q: (b, 0, 0)),      # M
            pl.BlockSpec((1, KV, C2), lambda b, q: (b, 0, 0)),     # pooled g
            pl.BlockSpec((C2, C), lambda b, q: (0, 0)),            # w_o
            pl.BlockSpec(memory_space=pltpu.MemorySpace.SMEM),     # gamma
        ],
        out_specs=pl.BlockSpec((1, tq, C), lambda b, q: (b, q, 0)),
    )

    kernel = functools.partial(_attention_kernel,
                               exp_in_bf16=(_tpu_generation() >= 6))

    out_flat = pl.pallas_call(
        kernel,
        out_shape=jax.ShapeDtypeStruct((B, HW, C), jnp.float32),
        grid_spec=grid_spec,
        compiler_params=pltpu.CompilerParams(
            # No cross-iteration scratch -> both axes split across TensorCores.
            dimension_semantics=("parallel", "parallel"),
            vmem_limit_bytes=vmem_limit),
        cost_estimate=cost,
    )(x_flat, m_fold, g_pool, wo_mat, gamma)

    out_nhwc = out_flat.reshape(B, H, W, C)
    if channels_last:
        return out_nhwc
    return jnp.transpose(out_nhwc, (0, 3, 1, 2))


# ---------------------------------------------------------------------------
# Pure-JAX reference (mirrors the PyTorch forward in NCHW) for validation.
# ---------------------------------------------------------------------------
def attention_reference(x, params):
    B, C, H, W = x.shape
    C8, C2 = C // 8, C // 2
    wt = spectral_normalize(params["w_theta"], params["u_theta"]).reshape(C8, C)
    wp = spectral_normalize(params["w_phi"], params["u_phi"]).reshape(C8, C)
    wg = spectral_normalize(params["w_g"], params["u_g"]).reshape(C2, C)
    wo = spectral_normalize(params["w_o"], params["u_o"]).reshape(C, C2)
    gamma = jnp.asarray(params["gamma"], jnp.float32)

    theta = jnp.einsum("oc,bchw->bohw", wt, x)
    phi_f = jnp.einsum("oc,bchw->bohw", wp, x)
    g_f = jnp.einsum("oc,bchw->bohw", wg, x)

    def maxpool2(z):
        b, c, h, w = z.shape
        return jnp.max(z.reshape(b, c, h // 2, 2, w // 2, 2), axis=(3, 5))

    theta = theta.reshape(B, C8, H * W)
    phi = maxpool2(phi_f).reshape(B, C8, H * W // 4)
    g = maxpool2(g_f).reshape(B, C2, H * W // 4)

    beta = jax.nn.softmax(jnp.einsum("bct,bcp->btp", theta, phi), axis=-1)
    o_pre = jnp.einsum("bcp,btp->bct", g, beta).reshape(B, C2, H, W)
    o = jnp.einsum("oc,bchw->bohw", wo, o_pre)
    return gamma * o + x


if __name__ == "__main__":
    key = jax.random.PRNGKey(0)
    B, C, H, W = 2, 64, 16, 16        # ch must be divisible by 8
    ks = jax.random.split(key, 10)

    def conv_w(k, out_ch, in_ch):
        return (jax.random.normal(k, (out_ch, in_ch, 1, 1), jnp.float32)
                / math.sqrt(in_ch))

    params = {
        "w_theta": conv_w(ks[0], C // 8, C),
        "w_phi":   conv_w(ks[1], C // 8, C),
        "w_g":     conv_w(ks[2], C // 2, C),
        "w_o":     conv_w(ks[3], C, C // 2),
        "u_theta": jax.random.normal(ks[4], (1, C // 8), jnp.float32),
        "u_phi":   jax.random.normal(ks[5], (1, C // 8), jnp.float32),
        "u_g":     jax.random.normal(ks[6], (1, C // 2), jnp.float32),
        "u_o":     jax.random.normal(ks[7], (1, C), jnp.float32),
        # PyTorch initializes gamma = 0.0 (output would trivially equal x);
        # use a nonzero deterministic value so the attention path is exercised.
        "gamma":   jnp.array(0.75, dtype=jnp.float32),
    }

    x = jax.random.normal(ks[8], (B, C, H, W), jnp.float32)

    # tq=64 -> 4 query tiles per batch element: exercises the q tiling and
    # the batch-broadcast index_maps of M / g.
    out = jax.block_until_ready(attention_forward(x, params, tq=64))
    ref = jax.block_until_ready(attention_reference(x, params))

    np.testing.assert_allclose(np.asarray(out), np.asarray(ref),
                               rtol=2e-2, atol=2e-2)
    print("KERNEL_OK")
</pallas_src>

<mosaic_0001>
module attributes {stable_mosaic.version = 11 : i64} {
  func.func @_attention_kernel(%arg0: i32, %arg1: i32, %arg2: memref<1x64x64xf32, #tpu.memory_space<vmem>>, %arg3: memref<1x64x64xbf16, #tpu.memory_space<vmem>>, %arg4: memref<1x64x32xbf16, #tpu.memory_space<vmem>>, %arg5: memref<32x64xbf16, #tpu.memory_space<vmem>>, %arg6: memref<1x1xf32, #tpu.memory_space<smem>>, %arg7: memref<1x64x64xf32, #tpu.memory_space<vmem>>) attributes {dimension_semantics = [#tpu.dimension_semantics<parallel>, #tpu.dimension_semantics<parallel>], iteration_bounds = array<i64: 2, 4>, scalar_prefetch = 0 : i64, scratch_operands = 0 : i64, tpu.core_type = #tpu.core_type<tc>, window_params = [{transform_indices = @transform_0, window_bounds = array<i64: 1, 64, 64>}, {transform_indices = @transform_1, window_bounds = array<i64: 1, 64, 64>}, {transform_indices = @transform_2, window_bounds = array<i64: 1, 64, 32>}, {pipeline_mode = #tpu.pipeline_mode<synchronous>, transform_indices = @transform_3, window_bounds = array<i64: 32, 64>}, {transform_indices = @transform_4, window_bounds = array<i64: 1, 1>}, {transform_indices = @transform_5, window_bounds = array<i64: 1, 64, 64>}]} {
    %c0 = arith.constant 0 : index
    %c0_0 = arith.constant 0 : index
    %c0_1 = arith.constant 0 : index
    %0 = vector.load %arg2[%c0, %c0_0, %c0_1] : memref<1x64x64xf32, #tpu.memory_space<vmem>>, vector<1x64x64xf32>
    %1 = vector.shape_cast %0 : vector<1x64x64xf32> to vector<64x64xf32>
    %2 = arith.truncf %1 : vector<64x64xf32> to vector<64x64xbf16>
    %c0_2 = arith.constant 0 : index
    %c0_3 = arith.constant 0 : index
    %c0_4 = arith.constant 0 : index
    %3 = vector.load %arg3[%c0_2, %c0_3, %c0_4] : memref<1x64x64xbf16, #tpu.memory_space<vmem>>, vector<1x64x64xbf16>
    %4 = vector.shape_cast %3 : vector<1x64x64xbf16> to vector<64x64xbf16>
    %cst = arith.constant dense<0.000000e+00> : vector<64x64xf32>
    %5 = tpu.matmul %2, %4, %cst {dimension_numbers = #tpu.dot_dimension_numbers<[1], [0], [0], [1], [0, 0, 1, 1], [], []>} : vector<64x64xbf16>, vector<64x64xbf16>, vector<64x64xf32> -> vector<64x64xf32>
    %cst_5 = arith.constant dense<0xFF800000> : vector<64xf32>
    %6 = vector.multi_reduction <maximumf>, %5, %cst_5 [1] : vector<64x64xf32> to vector<64xf32>
    %7 = vector.shape_cast %6 : vector<64xf32> to vector<64x1xf32>
    %8 = vector.broadcast %7 : vector<64x1xf32> to vector<64x64xf32>
    %9 = arith.subf %5, %8 : vector<64x64xf32>
    %10 = math.exp %9 : vector<64x64xf32>
    %cst_6 = arith.constant dense<0.000000e+00> : vector<64xf32>
    %11 = vector.multi_reduction <add>, %10, %cst_6 [1] : vector<64x64xf32> to vector<64xf32>
    %12 = vector.shape_cast %11 : vector<64xf32> to vector<64x1xf32>
    %13 = arith.truncf %10 : vector<64x64xf32> to vector<64x64xbf16>
    %c0_7 = arith.constant 0 : index
    %c0_8 = arith.constant 0 : index
    %c0_9 = arith.constant 0 : index
    %14 = vector.load %arg4[%c0_7, %c0_8, %c0_9] : memref<1x64x32xbf16, #tpu.memory_space<vmem>>, vector<1x64x32xbf16>
    %15 = vector.shape_cast %14 : vector<1x64x32xbf16> to vector<64x32xbf16>
    %cst_10 = arith.constant dense<0.000000e+00> : vector<64x32xf32>
    %16 = tpu.matmul %13, %15, %cst_10 {dimension_numbers = #tpu.dot_dimension_numbers<[1], [0], [0], [1], [0, 0, 1, 1], [], []>} : vector<64x64xbf16>, vector<64x32xbf16>, vector<64x32xf32> -> vector<64x32xf32>
    %17 = tpu.reciprocal %12 {approx = true} : vector<64x1xf32> -> vector<64x1xf32>
    %18 = vector.broadcast %17 : vector<64x1xf32> to vector<64x32xf32>
    %19 = arith.mulf %16, %18 : vector<64x32xf32>
    %20 = arith.truncf %19 : vector<64x32xf32> to vector<64x32xbf16>
    %c0_11 = arith.constant 0 : index
    %c0_12 = arith.constant 0 : index
    %21 = vector.load %arg5[%c0_11, %c0_12] : memref<32x64xbf16, #tpu.memory_space<vmem>>, vector<32x64xbf16>
    %cst_13 = arith.constant dense<0.000000e+00> : vector<64x64xf32>
    %22 = tpu.matmul %20, %21, %cst_13 {dimension_numbers = #tpu.dot_dimension_numbers<[1], [0], [0], [1], [0, 0, 1, 1], [], []>} : vector<64x32xbf16>, vector<32x64xbf16>, vector<64x64xf32> -> vector<64x64xf32>
    %c0_14 = arith.constant 0 : index
    %c0_15 = arith.constant 0 : index
    %23 = memref.load %arg6[%c0_14, %c0_15] : memref<1x1xf32, #tpu.memory_space<smem>>
    %24 = vector.broadcast %23 : f32 to vector<64x64xf32>
    %25 = arith.mulf %24, %22 : vector<64x64xf32>
    %26 = arith.addf %25, %1 : vector<64x64xf32>
    %c0_16 = arith.constant 0 : index
    %c0_17 = arith.constant 0 : index
    %c0_18 = arith.constant 0 : index
    %27 = vector.load %arg7[%c0_16, %c0_17, %c0_18] : memref<1x64x64xf32, #tpu.memory_space<vmem>>, vector<1x64x64xf32>
    %28 = vector.shape_cast %27 : vector<1x64x64xf32> to vector<64x64xf32>
    %29 = vector.shape_cast %26 : vector<64x64xf32> to vector<1x64x64xf32>
    tpu.vector_store %arg7[%c0_16, %c0_17, %c0_18], %29 {strides = array<i32>} : memref<1x64x64xf32, #tpu.memory_space<vmem>>, vector<1x64x64xf32>,
    return
  }
  func.func @transform_0(%arg0: i32, %arg1: i32) -> (i32, i32, i32) {
    %c0_i32 = arith.constant 0 : i32
    %c0_i32_0 = arith.constant 0 : i32
    return %arg0, %arg1, %c0_i32 : i32, i32, i32
  }
  func.func @transform_1(%arg0: i32, %arg1: i32) -> (i32, i32, i32) {
    %c0_i32 = arith.constant 0 : i32
    %c0_i32_0 = arith.constant 0 : i32
    %c0_i32_1 = arith.constant 0 : i32
    return %arg0, %c0_i32, %c0_i32_0 : i32, i32, i32
  }
  func.func @transform_2(%arg0: i32, %arg1: i32) -> (i32, i32, i32) {
    %c0_i32 = arith.constant 0 : i32
    %c0_i32_0 = arith.constant 0 : i32
    %c0_i32_1 = arith.constant 0 : i32
    return %arg0, %c0_i32, %c0_i32_0 : i32, i32, i32
  }
  func.func @transform_3(%arg0: i32, %arg1: i32) -> (i32, i32) {
    %c0_i32 = arith.constant 0 : i32
    %c0_i32_0 = arith.constant 0 : i32
    %c0_i32_1 = arith.constant 0 : i32
    return %c0_i32, %c0_i32_0 : i32, i32
  }
  func.func @transform_4(%arg0: i32, %arg1: i32) -> (i32, i32) {
    %c0_i32 = arith.constant 0 : i32
    %c0_i32_0 = arith.constant 0 : i32
    %c0_i32_1 = arith.constant 0 : i32
    return %c0_i32, %c0_i32_0 : i32, i32
  }
  func.func @transform_5(%arg0: i32, %arg1: i32) -> (i32, i32, i32) {
    %c0_i32 = arith.constant 0 : i32
    %c0_i32_0 = arith.constant 0 : i32
    return %arg0, %arg1, %c0_i32 : i32, i32, i32
  }
}

</mosaic_0001>

<bundles_post_ra>
// kernel: tpu_custom_call.1
= control target key start
LH: loop header
LB: loop body
LE: loop exit
PB: predicated region body
PF: predicated region fallthrough
CT: control target
= control target key end

     0   :  { %s1133_s20 = smov 0   ;;  %s1135_s21 = smov 0   ;;  %s1273_s0 = inlined_call_operand.vmem [shape: f32[2,256,64], index: 0, kind: input, shape index: {}]   ;;  %s1274_s1 = inlined_call_operand.vmem [shape: bf16[2,64,64], index: 1, kind: input, shape index: {}]   ;;  %s1275_s2 = inlined_call_operand.vmem [shape: bf16[2,64,32], index: 2, kind: input, shape index: {}]   ;;  %s1276_s3 = inlined_call_operand.vmem [shape: bf16[32,64], index: 3, kind: input, shape index: {}]   ;;  %s1277_s4 = inlined_call_operand.<no memory space> [shape: f32[1,1], index: 4, kind: input, shape index: {}]   ;;  %s1278_s5 = inlined_call_operand.vmem [shape: f32[2,256,64], index: 5, kind: output, shape index: {}]  }
   0x1   :  { %10 = sst [smem:[#allocation2]] %s1277_s4  ;;  %s1137_s22 = smov 0  }
   0x2   :  { %s1139_s23 = smov 0   ;;  %s1141_s24 = smov 0  }
   0x3 LB: > { %s25_s4 = sadd.s32 1, %s1090_s22  ;;  %s28_s25 = sadd.s32 1, %s1094_s23  ;;  %s1098_s24 = sphi %s1141_s24, %s16_s24   ;;  %s1094_s23 = sphi %s1139_s23, %s1282_s23   ;;  %s1090_s22 = sphi %s1137_s22, %s1281_s22   ;;  %s1086_s21 = sphi %s1135_s21, %s1280_s21   ;;  %s1082_s20 = sphi %s1133_s20, %s1279_s20  }
   0x4   : > { %p26_p0 = scmp.ge.s32.totalorder %s25_s4, 4  ;;  %p871_p1 = scmp.ge.s32.totalorder %s1098_s24, 1 }
   0x5   : > { %p229_p2 = scmp.lt.s32.totalorder %s1098_s24, 9 }
   0x6   : > { %s1284_s4 = smov (%p26_p0, %s25_s4), 0  ;;  %s1286_s25 = smov (!%p26_p0, %s28_s25), %s1094_s23 }
   0x7   : > { %p230_p3 = pnand %p871_p1, %p229_p2  ;;  %p30_p4 = scmp.ge.s32.totalorder %s1286_s25, 2 }
   0x8   : > { %p276_p5 = scmp.lt.s32.totalorder (!%p230_p3), %s1086_s21, 1  ;;  %s872_s26 = sshll.u32 (!%p230_p3), %s1082_s20, 3 }
   0x9   : > { %s1288_s25 = smov (%p30_p4, %s1286_s25), 0  ;;  %233 = sbr.rel (%p230_p3) target bundleno = 812 (0x32c), region = 40 }
   0xa   : > { %p278_p6 = scmp.lt.s32.totalorder (!%p230_p3), %s872_s26, 31  ;;  %s727_s18 = sld [smem:[#allocation2]] (!%p230_p3) }
   0xe   : > { %s1290_s21 = smov (!%p276_p5, %s1086_s21), 1  ;;  %s1292_s26 = smov (!%p278_p6, %s872_s26), 31  ;;  %vm350_vm0 = vcmask 523264   ;;  %vm649_vm1 = vcmask 261120  }
   0xf   : > { %s1163_s27 = sshll.u32 %s1290_s21, 5 }
  0x10   : > { %s289_s30 = scalar_lea.vmem %s1274_s1, %s1163_s27  ;;  %s281_s6 = sadd.s32 %s1163_s27, %s1292_s26 }
  0x11   : > { %v1018_v0 = vld [vmem:[%s289_s30 + $0x18] sm:$0xff]   ;;  %s1170_s7 = sshll.u32 %s281_s6, 3  ;;  %v1019_v1 = vld [vmem:[%s289_s30 + $0x10] sm:$0xff]   ;;  %v1020_v2 = vld [vmem:[%s289_s30 + $0x8] sm:$0xff]   ;;  %s294_s13 = scalar_lea.vmem %s1275_s2, %s1163_s27 }
  0x12   : > { %s283_s10 = scalar_lea.vmem %s1273_s0, %s1170_s7  ;;  %930 = vmatprep.subr.bf16.mxu0 %v1018_v0  ;;  %v1021_v6 = vld [vmem:[%s289_s30] sm:$0xff]   ;;  %v1022_v32 = vld [vmem:[%s294_s13 + $0x18] sm:$0xff]   ;;  %v1023_v33 = vld [vmem:[%s294_s13 + $0x10] sm:$0xff]   ;;  %s303_s21 = scalar_lea.vmem %s1278_s5, %s1170_s7 }
  0x13   : > { %931 = vmatpush3.bf16.msra.mxu0 %v1018_v0  ;;  %v1176_v3 = vld [vmem:[%s283_s10] sm:$0xff]  ;;  %v1178_v4 = vld [vmem:[%s283_s10 + $0x8] sm:$0xff]  ;;  %v1183_v7 = vld [vmem:[%s283_s10 + $0x10] sm:$0xff]  ;;  %946 = vmatprep.subr.bf16.mxu1 %v1022_v32 }
  0x14   : > { %932 = vmatprep.subr.bf16.mxu0 %v1019_v1  ;;  %v314_v5 = vpack.c.bf16 %v1178_v4, %v1176_v3  ;;  %v1185_v8 = vld [vmem:[%s283_s10 + $0x18] sm:$0xff]  ;;  %v1187_v9 = vld [vmem:[%s283_s10 + $0x20] sm:$0xff]  ;;  %v1189_v10 = vld [vmem:[%s283_s10 + $0x28] sm:$0xff]  ;;  %947 = vmatpush3.bf16.msra.mxu1 %v1022_v32 }
  0x15   : > { %v315_v11 = vpack.c.bf16 %v1185_v8, %v1183_v7  ;;  %v316_v12 = vpack.c.bf16 %v1189_v10, %v1187_v9  ;;  %v1197_v13 = vld [vmem:[%s283_s10 + $0x30] sm:$0xff]  ;;  %v1199_v14 = vld [vmem:[%s283_s10 + $0x38] sm:$0xff]  ;;  %948 = vmatprep.subr.bf16.mxu1 %v1023_v33  ;;  %v1024_v34 = vld [vmem:[%s294_s13 + $0x8] sm:$0xff]  }
  0x16   : > { %938 = vmatprep.mubr.msk.bf16.mxu0 %vm350_vm0, %v314_v5  ;;  %v317_v15 = vpack.c.bf16 %v1199_v14, %v1197_v13  ;;  %v1025_v35 = vld [vmem:[%s294_s13] sm:$0xff]  }
  0x17   : > { %933 = vmatpush3.bf16.msra.mxu0 %v1019_v1 }
  0x18   : > { %934 = vmatprep.subr.bf16.mxu0 %v1020_v2  ;;  %949 = vmatpush3.bf16.msra.mxu1 %v1023_v33 }
  0x19   : > { %950 = vmatprep.subr.bf16.mxu1 %v1024_v34 }
  0x1b   : > { %935 = vmatpush3.bf16.msra.mxu0 %v1020_v2 }
  0x1c   : > { %936 = vmatprep.subr.bf16.mxu0 %v1021_v6  ;;  %951 = vmatpush3.bf16.msra.mxu1 %v1024_v34 }
  0x1d   : > { %952 = vmatprep.subr.bf16.mxu1 %v1025_v35 }
  0x1f   : > { %937 = vmatpush3.bf16.msra.mxu0 %v1021_v6 }
  0x20   : > { %953 = vmatpush3.bf16.msra.mxu1 %v1025_v35 }
  0x22   : > { %939 = vmatmul.mubr.msk.bf16.vlgmr.msra.gmra.mxu0 %vm350_vm0, %v315_v11 }
  0x23   : > { %942 = vmatprep.mubr.msk.bf16.mxu0 %vm350_vm0, %v316_v12 }
  0x2a   : > { %943 = vmatmul.mubr.msk.bf16.gmra.mxu0 %vm350_vm0, %v317_v15 }
  0xe2   : > { %v940_v16 = vpop.f32.mrf.mxu0 }
  0xe3   : > { %v434_v17 = vsel %vm350_vm0, %v940_v16, -inf }
  0xe4   : > { %435 = vmax.xlane.f32.xlu1 %v434_v17  ;;  %v397_v18 = vpop.f32.mrf.mxu0 }
  0xe5   : > { %v428_v19 = vsel %vm350_vm0, %v397_v18, -inf }
  0xe6   : > { %429 = vmax.xlane.f32.xlu0 %v428_v19  ;;  %v941_v20 = vpop.f32.mrf.mxu0 }
  0xe7   : > { %v437_v21 = vsel %vm350_vm0, %v941_v20, -inf }
  0xe8   : > { %438 = vmax.xlane.f32.xlu1 %v437_v21  ;;  %v400_v22 = vpop.f32.mrf.mxu0 }
  0xe9   : > { %v431_v23 = vsel %vm350_vm0, %v400_v22, -inf }
  0xea   : > { %432 = vmax.xlane.f32.xlu0 %v431_v23  ;;  %v944_v24 = vpop.f32.mrf.mxu0 }
  0xeb   : > { %v446_v29 = vsel %vm350_vm0, %v944_v24, -inf }
  0xec   : > { %v413_v25 = vpop.f32.mrf.mxu0 }
  0xed   : > { %v440_v26 = vsel %vm350_vm0, %v413_v25, -inf }
  0xee   : > { %441 = vmax.xlane.f32.xlu0 %v440_v26  ;;  %v945_v27 = vpop.f32.mrf.mxu0 }
  0xef   : > { %v449_v31 = vsel %vm350_vm0, %v945_v27, -inf }
  0xf0   : > { %v416_v28 = vpop.f32.mrf.mxu0 }
  0xf1   : > { %v443_v30 = vsel %vm350_vm0, %v416_v28, -inf }
  0xf2   : > { %447 = vmax.xlane.f32.xlu0 %v446_v29  ;;  %444 = vmax.xlane.f32.xlu1 %v443_v30 }
  0xf6   : > { %450 = vmax.xlane.f32.xlu1 %v449_v31 }
 0x16d   : > { %v436_v36 = vpop.xlane.xlu1 %435 }
 0x16e   : > { %v454_v37 = vsub.f32 %v940_v16, %v436_v36 }
 0x16f   : > { %v430_v38 = vpop.xlane.xlu0 %429 }
 0x170   : > { %v464_v39 = vmul.f32 1.442695, %v454_v37  ;;  %v452_v40 = vsub.f32 %v397_v18, %v430_v38 }
 0x171   : > { %v439_v41 = vpop.xlane.xlu1 %438 }
 0x172   : > { %1028 = vpow2.f32 %v464_v39  ;;  %v460_v42 = vmul.f32 1.442695, %v452_v40  ;;  %v455_v43 = vsub.f32 %v941_v20, %v439_v41 }
 0x173   : > { %v433_v44 = vpop.xlane.xlu0 %432 }
 0x174   : > { %1030 = vpow2.f32 %v460_v42  ;;  %v466_v45 = vmul.f32 1.442695, %v455_v43  ;;  %v453_v46 = vsub.f32 %v400_v22, %v433_v44 }
 0x176   : > { %1032 = vpow2.f32 %v466_v45  ;;  %v462_v47 = vmul.f32 1.442695, %v453_v46 }
 0x177   : > { %v442_v48 = vpop.xlane.xlu0 %441 }
 0x178   : > { %1034 = vpow2.f32 %v462_v47  ;;  %v456_v49 = vsub.f32 %v413_v25, %v442_v48  ;;  %v1027_v25 = vld [vmem:[%s1276_s3] sm:$0xff]  }
 0x17a   : > { %v468_v50 = vmul.f32 1.442695, %v456_v49 }
 0x17b   : > { %v448_v51 = vpop.xlane.xlu0 %447  ;;  %v445_v52 = vpop.xlane.xlu1 %444 }
 0x17c   : > { %1036 = vpow2.f32 %v468_v50  ;;  %v458_v53 = vsub.f32 %v944_v24, %v448_v51  ;;  %v457_v54 = vsub.f32 %v416_v28, %v445_v52  ;;  %v1026_v24 = vld [vmem:[%s1276_s3 + $0x8] sm:$0xff]  }
 0x17d   : > { %962 = vmatprep.subr.bf16.mxu0 %v1026_v24  ;;  %974 = vmatprep.subr.bf16.mxu1 %v1026_v24 }
 0x17e   : > { %v472_v55 = vmul.f32 1.442695, %v458_v53  ;;  %v470_v56 = vmul.f32 1.442695, %v457_v54  ;;  %963 = vmatpush3.bf16.msra.mxu0 %v1026_v24 }
 0x17f   : > { %v1029_v57 = vpop.eup %1028  ;;  %v451_v58 = vpop.xlane.xlu1 %450  ;;  %964 = vmatprep.subr.bf16.mxu0 %v1027_v25 }
 0x180   : > { %1038 = vpow2.f32 %v472_v55  ;;  %v459_v59 = vsub.f32 %v945_v27, %v451_v58  ;;  %v482_v60 = vsel %vm350_vm0, %v1029_v57, 0.0 }
 0x181   : > { %v1031_v61 = vpop.eup %1030  ;;  %1040 = vpow2.f32 %v470_v56  ;;  %483 = vadd.xlane.f32.xlu0 %v482_v60 }
 0x182   : > { %v474_v62 = vmul.f32 1.442695, %v459_v59  ;;  %v476_v0 = vsel %vm350_vm0, %v1031_v61, 0.0  ;;  %965 = vmatpush3.bf16.msra.mxu0 %v1027_v25 }
 0x183   : > { %v1033_v63 = vpop.eup %1032 }
 0x184   : > { %1042 = vpow2.f32 %v474_v62  ;;  %v485_v1 = vsel %vm350_vm0, %v1033_v63, 0.0  ;;  %v501_v6 = vpack.c.bf16 %v1033_v63, %v1029_v57  ;;  %v728_v62 = vstv %s727_s18 }
 0x185   : > { %v1035_v2 = vpop.eup %1034  ;;  %477 = vadd.xlane.f32.xlu0 %v476_v0  ;;  %486 = vadd.xlane.f32.xlu1 %v485_v1 }
 0x186   : > { %v500_v5 = vpack.c.bf16 %v1035_v2, %v1031_v61  ;;  %v479_v11 = vsel %vm350_vm0, %v1035_v2, 0.0 }
 0x188   : > { %954 = vmatprep.mubr.msk.bf16.mxu1 %vm350_vm0, %v500_v5 }
 0x189   : > { %v1037_v12 = vpop.eup %1036  ;;  %955 = vmatmul.mubr.msk.bf16.vlgmr.msra.gmra.mxu1 %vm350_vm0, %v501_v6  ;;  %480 = vadd.xlane.f32.xlu1 %v479_v11 }
 0x18a   : > { %v488_v15 = vsel %vm350_vm0, %v1037_v12, 0.0  ;;  %976 = vmatpush3.bf16.msra.mxu1 %v1026_v24 }
 0x18b   : > { %489 = vadd.xlane.f32.xlu0 %v488_v15  ;;  %975 = vmatprep.subr.bf16.mxu1 %v1027_v25 }
 0x18d   : > { %v1039_v16 = vpop.eup %1038 }
 0x18e   : > { %v1041_v17 = vpop.eup %1040  ;;  %v494_v18 = vsel %vm350_vm0, %v1039_v16, 0.0  ;;  %977 = vmatpush3.bf16.msra.mxu1 %v1027_v25 }
 0x18f   : > { %495 = vadd.xlane.f32.xlu0 %v494_v18  ;;  %v491_v19 = vsel %vm350_vm0, %v1041_v17, 0.0  ;;  %v502_v20 = vpack.c.bf16 %v1041_v17, %v1037_v12 }
 0x190   : > { %492 = vadd.xlane.f32.xlu1 %v491_v19 }
 0x191   : > { %v1043_v21 = vpop.eup %1042  ;;  %958 = vmatprep.mubr.msk.bf16.mxu1 %vm350_vm0, %v502_v20 }
 0x192   : > { %v497_v22 = vsel %vm350_vm0, %v1043_v21, 0.0  ;;  %v503_v23 = vpack.c.bf16 %v1043_v21, %v1039_v16 }
 0x194   : > { %498 = vadd.xlane.f32.xlu1 %v497_v22  ;;  %959 = vmatmul.mubr.msk.bf16.gmra.mxu1 %vm350_vm0, %v503_v23 }
 0x20a   : > { %v484_v26 = vpop.xlane.xlu0 %483 }
 0x20e   : > { %v487_v27 = vpop.xlane.xlu1 %486  ;;  %v478_v28 = vpop.xlane.xlu0 %477 }
 0x20f   : > { %1044 = vrcp.f32 %v478_v28 }
 0x210   : > { %1046 = vrcp.f32 %v487_v27 }
 0x212   : > { %v481_v29 = vpop.xlane.xlu1 %480 }
 0x213   : > { %1048 = vrcp.f32 %v481_v29 }
 0x214   : > { %1050 = vrcp.f32 %v484_v26  ;;  %v490_v31 = vpop.xlane.xlu0 %489 }
 0x215   : > { %1052 = vrcp.f32 %v490_v31 }
 0x218   : > { %v496_v34 = vpop.xlane.xlu0 %495 }
 0x219   : > { %v493_v30 = vpop.xlane.xlu1 %492 }
 0x21c   : > { %v1045_v36 = vpop.eup %1044 }
 0x21d   : > { %v499_v32 = vpop.xlane.xlu1 %498  ;;  %v1047_v38 = vpop.eup %1046 }
 0x21e   : > { %1054 = vrcp.f32 %v499_v32 }
 0x21f   : > { %1056 = vrcp.f32 %v493_v30 }
 0x220   : > { %1058 = vrcp.f32 %v496_v34  ;;  %v1049_v39 = vpop.eup %1048 }
 0x221   : > { %v1051_v42 = vpop.eup %1050 }
 0x222   : > { %v1053_v50 = vpop.eup %1052 }
 0x22b   : > { %v1055_v52 = vpop.eup %1054 }
 0x22c   : > { %v1057_v53 = vpop.eup %1056 }
 0x22d   : > { %v1059_v56 = vpop.eup %1058 }
 0x249   : > { %v956_v33 = vpop.f32.mrf.mxu1 }
 0x24a   : > { %v623_v45 = vmul.f32 %v1051_v42, %v956_v33 }
 0x24b   : > { %v582_v35 = vpop.f32.mrf.mxu1 }
 0x24c   : > { %v621_v43 = vmul.f32 %v1045_v36, %v582_v35 }
 0x24d   : > { %v957_v37 = vpop.f32.mrf.mxu1 }
 0x24e   : > { %v624_v40 = vmul.f32 %v1047_v38, %v957_v37 }
 0x24f   : > { %v585_v41 = vpop.f32.mrf.mxu1 }
 0x250   : > { %v622_v44 = vmul.f32 %v1049_v39, %v585_v41  ;;  %v630_v47 = vpack.c.bf16 %v624_v40, %v623_v45 }
 0x252   : > { %v629_v46 = vpack.c.bf16 %v622_v44, %v621_v43 }
 0x254   : > { %v960_v48 = vpop.f32.mrf.mxu1  ;;  %966 = vmatprep.mubr.msk.bf16.mxu0 %vm649_vm1, %v629_v46 }
 0x255   : > { %967 = vmatmul.mubr.msk.bf16.vlgmr.msra.gmra.mxu0 %vm649_vm1, %v630_v47  ;;  %v627_v59 = vmul.f32 %v1059_v56, %v960_v48 }
 0x256   : > { %v598_v49 = vpop.f32.mrf.mxu1 }
 0x257   : > { %v625_v57 = vmul.f32 %v1053_v50, %v598_v49 }
 0x258   : > { %v961_v51 = vpop.f32.mrf.mxu1 }
 0x259   : > { %v628_v54 = vmul.f32 %v1055_v52, %v961_v51 }
 0x25a   : > { %v601_v55 = vpop.f32.mrf.mxu1 }
 0x25b   : > { %v626_v58 = vmul.f32 %v1057_v53, %v601_v55  ;;  %v632_v61 = vpack.c.bf16 %v628_v54, %v627_v59 }
 0x25d   : > { %v631_v60 = vpack.c.bf16 %v626_v58, %v625_v57 }
 0x25f   : > { %970 = vmatprep.mubr.msk.bf16.mxu1 %vm649_vm1, %v631_v60 }
 0x260   : > { %971 = vmatmul.mubr.msk.bf16.vlgmr.msra.gmra.mxu1 %vm649_vm1, %v632_v61 }
 0x315   : > { %v968_v63 = vpop.f32.mrf.mxu0 }
 0x316   : > { %v731_v0 = vmul.f32 %v968_v63, %v728_v62 }
 0x317   : > { %v696_v1 = vpop.f32.mrf.mxu0 }
 0x318   : > { %v739_v2 = vadd.f32 %v731_v0, %v1183_v7  ;;  %v729_v5 = vmul.f32 %v728_v62, %v696_v1 }
 0x319   : > { %v969_v6 = vpop.f32.mrf.mxu0 }
 0x31a   : > { %747 = vst.msk [vmem:[%s303_s21 + $0x10] sm:$0xff] %vm350_vm0, %v739_v2  ;;  %v737_v11 = vadd.f32 %v729_v5, %v1176_v3  ;;  %v732_v12 = vmul.f32 %v969_v6, %v728_v62 }
 0x31b   : > { %v699_v15 = vpop.f32.mrf.mxu0 }
 0x31c   : > { %745 = vst.msk [vmem:[%s303_s21] sm:$0xff] %vm350_vm0, %v737_v11  ;;  %v740_v16 = vadd.f32 %v732_v12, %v1185_v8  ;;  %v730_v17 = vmul.f32 %v728_v62, %v699_v15 }
 0x31e   : > { %748 = vst.msk [vmem:[%s303_s21 + $0x18] sm:$0xff] %vm350_vm0, %v740_v16  ;;  %v738_v18 = vadd.f32 %v730_v17, %v1178_v4 }
 0x320   : > { %746 = vst.msk [vmem:[%s303_s21 + $0x8] sm:$0xff] %vm350_vm0, %v738_v18  ;;  %v972_v7 = vpop.f32.mrf.mxu1 }
 0x321   : > { %v735_v19 = vmul.f32 %v972_v7, %v728_v62 }
 0x322   : > { %v712_v20 = vpop.f32.mrf.mxu1 }
 0x323   : > { %v743_v21 = vadd.f32 %v735_v19, %v1197_v13  ;;  %v733_v22 = vmul.f32 %v728_v62, %v712_v20 }
 0x324   : > { %v973_v3 = vpop.f32.mrf.mxu1 }
 0x325   : > { %751 = vst.msk [vmem:[%s303_s21 + $0x30] sm:$0xff] %vm350_vm0, %v743_v21  ;;  %v741_v23 = vadd.f32 %v733_v22, %v1187_v9  ;;  %v736_v24 = vmul.f32 %v973_v3, %v728_v62 }
 0x326   : > { %v715_v8 = vpop.f32.mrf.mxu1 }
 0x327   : > { %749 = vst.msk [vmem:[%s303_s21 + $0x20] sm:$0xff] %vm350_vm0, %v741_v23  ;;  %v744_v25 = vadd.f32 %v736_v24, %v1199_v14  ;;  %v734_v4 = vmul.f32 %v728_v62, %v715_v8 }
 0x329   : > { %752 = vst.msk [vmem:[%s303_s21 + $0x38] sm:$0xff] %vm350_vm0, %v744_v25  ;;  %v742_v26 = vadd.f32 %v734_v4, %v1189_v10 }
 0x32b   : > { %750 = vst.msk [vmem:[%s303_s21 + $0x28] sm:$0xff] %vm350_vm0, %v742_v26 }
 0x32c PF: > { %s16_s24 = sadd.s32 1, %s1098_s24   ;;  %s1279_s20 = smov %s1090_s22 }
 0x32d   : > { %p13_p7 = scmp.ge.s32.totalorder %s16_s24, 10   ;;  %s1280_s21 = smov %s1094_s23 }
 0x32e   : > { %s1281_s22 = smov %s1284_s4  ;;  %s1282_s23 = smov %s1288_s25 }
 0x32f   :  { %15 = sbr.rel (!%p13_p7) target bundleno = 3 (0x3), region = 76 }

</bundles_post_ra>
